<compile_context>
chip_gen: v5e
topology: v5e:2x2
jax: 0.10.0
libtpu: 0.0.40
codegen_flags: <defaults>
</compile_context>

<pallas_src>
import functools

import jax
import jax.numpy as jnp
from jax.experimental import pallas as pl
from jax.experimental.pallas import tpu as pltpu


_LANE = 128        # lane width of a vreg / MXU-friendly K & N
_MAX_TILE_B = 512  # upper bound on the batch tile of one grid step


def _round_up(v, m):
    return -(-v // m) * m


def _vmem_budget():
    """Returns (planning_budget_bytes, vmem_limit_bytes) from the chip's VMEM."""
    default_cap = 64 * 1024 * 1024            # conservative: v7x per-core VMEM
    try:
        info = pltpu.get_tpu_info()
        cap = int(getattr(info, "vmem_capacity_bytes", default_cap))
    except Exception:                          # pragma: no cover - older runtimes
        cap = default_cap
    plan_budget = cap // 2                     # headroom for compiler scratch
    vmem_limit = min(cap * 3 // 4, 128 * 1024 * 1024)
    return plan_budget, vmem_limit


def _batch_path_bytes(tile_b, Dp, Hp, Cp, isz, double_buffered):
    """Estimated VMEM footprint of the batch-only-tiled kernel (bytes)."""
    buf = 2 if double_buffered else 1
    total = buf * tile_b * Dp * isz              # x tile
    total += buf * (Dp * Hp + Hp * Cp) * isz     # resident weights
    total += buf * (Hp + Cp) * 4                 # f32 biases
    total += buf * tile_b * Cp * 4               # output tile
    total += tile_b * Hp * 4                     # f32 hidden intermediate
    return total


def _htiled_bytes(tile_b, Dp, ht, Cp, isz):
    """Estimated VMEM footprint of the hidden-tiled accumulator kernel."""
    total = 2 * tile_b * Dp * isz                # x tile
    total += 2 * (Dp * ht + ht * Cp) * isz       # weight tiles
    total += 2 * (ht + Cp) * 4                   # bias tiles
    total += 2 * tile_b * Cp * 4                 # output tile
    total += tile_b * Cp * 4                     # f32 accumulator scratch
    total += tile_b * ht * 4                     # f32 hidden intermediate
    return total


def _pick_h_tile(tile_b, Dp, Hp, Cp, isz, budget):
    """Largest 128-multiple hidden tile (dividing padded H) that fits budget."""
    n128 = Hp // _LANE
    for k in range(n128 - 1, 0, -1):
        if n128 % k:
            continue
        ht = k * _LANE
        if _htiled_bytes(tile_b, Dp, ht, Cp, isz) <= budget:
            return ht
    return _LANE if Hp > _LANE else None        # best effort


# ----------------------------------------------------------------------------
# Pallas kernels: fused MLP  out = relu(x @ w1 + b1) @ w2 + b2
# All dims arrive pre-padded to MXU/lane-friendly sizes; f32 accumulation.
# ----------------------------------------------------------------------------
def _mlp_kernel(x_ref, w1_ref, b1_ref, w2_ref, b2_ref, o_ref):
    hid = jnp.dot(x_ref[...], w1_ref[...],
                  preferred_element_type=jnp.float32)        # MXU, f32 acc
    hid = jnp.maximum(hid + b1_ref[...], 0.0)                # bias+ReLU on VPU
    out = jnp.dot(hid.astype(w2_ref.dtype), w2_ref[...],
                  preferred_element_type=jnp.float32)        # MXU, f32 acc
    o_ref[...] = (out + b2_ref[...]).astype(o_ref.dtype)     # lane-dense store


def _mlp_kernel_htiled(x_ref, w1_ref, b1_ref, w2_ref, b2_ref, o_ref, acc_ref):
    """Hidden-dim tiled variant: acc += relu(x@w1[:,h] + b1[h]) @ w2[h,:]."""
    h = pl.program_id(1)

    @pl.when(h == 0)
    def _init():
        acc_ref[...] = jnp.zeros_like(acc_ref)

    hid = jnp.dot(x_ref[...], w1_ref[...],
                  preferred_element_type=jnp.float32)
    hid = jnp.maximum(hid + b1_ref[...], 0.0)
    acc_ref[...] += jnp.dot(hid.astype(w2_ref.dtype), w2_ref[...],
                            preferred_element_type=jnp.float32)

    @pl.when(h == pl.num_programs(1) - 1)
    def _finalize():
        o_ref[...] = (acc_ref[...] + b2_ref[...]).astype(o_ref.dtype)


# ----------------------------------------------------------------------------
# One-time parameter preparation (hoisted out of the per-forward path)
# ----------------------------------------------------------------------------
def prepare_mlp_params(w1, b1, w2, b2, compute_dtype=jnp.float32):
    """Pad weights/biases to 128-lane multiples and cast weights ONCE.

    bf16 operands are worthwhile on every TPU generation (the v5e MXU is
    natively bf16 too; bias-add and ReLU run on the f32 accumulator), halving
    DMA bytes and VMEM footprint.
    """
    D, H = w1.shape
    H2, C = w2.shape
    assert H2 == H, "w1/w2 hidden dims disagree"
    Dp, Hp, Cp = (_round_up(v, _LANE) for v in (D, H, C))
    w1_p = jnp.pad(jnp.asarray(w1, jnp.float32),
                   ((0, Dp - D), (0, Hp - H))).astype(compute_dtype)
    w2_p = jnp.pad(jnp.asarray(w2, jnp.float32),
                   ((0, Hp - H), (0, Cp - C))).astype(compute_dtype)
    b1_p = jnp.pad(jnp.asarray(b1, jnp.float32).reshape(1, -1),
                   ((0, 0), (0, Hp - H)))
    b2_p = jnp.pad(jnp.asarray(b2, jnp.float32).reshape(1, -1),
                   ((0, 0), (0, Cp - C)))
    return w1_p, b1_p, w2_p, b2_p


# ----------------------------------------------------------------------------
# Fused forward
# ----------------------------------------------------------------------------
@functools.partial(jax.jit,
                   static_argnames=("out_features", "out_dtype", "h_tile"))
def mlp_forward(x, w1_p, b1_p, w2_p, b2_p, *, out_features,
                out_dtype=jnp.float32, h_tile=None):
    """relu(x @ w1 + b1) @ w2 + b2 on pre-padded params from prepare_mlp_params.

    out_dtype=jnp.bfloat16 halves output writeback if the consumer tolerates it.
    h_tile forces the hidden-tiled accumulator path (otherwise auto by VMEM).
    """
    B, D = x.shape
    Dp, Hp = w1_p.shape
    Cp = w2_p.shape[1]
    compute_dtype = w1_p.dtype
    isz = jnp.dtype(compute_dtype).itemsize
    sub = 16 if isz == 2 else 8                 # full sublane packing for bf16

    plan_budget, vmem_limit = _vmem_budget()

    # ---- batch tiling: minimal padding waste; >=2 tiles for large batches --
    B8 = _round_up(max(B, 1), sub)
    if B8 <= _MAX_TILE_B:
        n_bt, tile_b = 1, B8
    else:
        n_bt = pl.cdiv(B8, _MAX_TILE_B)
        tile_b = _round_up(pl.cdiv(B8, n_bt), sub)
    Bp = n_bt * tile_b

    # Pad x once, directly in the compute dtype (no f32 round trip).
    x_p = jnp.pad(x.astype(compute_dtype), ((0, Bp - B), (0, Dp - D)))

    # ---- hidden tiling (VMEM-bound fallback / forced) ----------------------
    if h_tile is not None:
        ht = int(h_tile)
        if ht % _LANE or Hp % ht:
            raise ValueError("h_tile must be a multiple of 128 dividing padded H")
        if ht >= Hp:
            ht = None
    else:
        ht = None
        if _batch_path_bytes(tile_b, Dp, Hp, Cp, isz, n_bt > 1) > plan_budget:
            ht = _pick_h_tile(tile_b, Dp, Hp, Cp, isz, plan_budget)

    flops = 2 * Bp * Hp * (Dp + Cp)
    bytes_accessed = ((Bp * Dp + Dp * Hp + Hp * Cp) * isz
                      + (Hp + Cp) * 4
                      + Bp * Cp * jnp.dtype(out_dtype).itemsize)
    cost = pl.CostEstimate(flops=flops, transcendentals=0,
                           bytes_accessed=bytes_accessed)
    out_shape = jax.ShapeDtypeStruct((Bp, Cp), out_dtype)
    args = (x_p, w1_p, b1_p, w2_p, b2_p)

    # TODO(synk): once pipeline_mode=pl.Buffered(1) is reliably supported by
    # pallas_call on TPU, single-buffer the constant-index weight specs instead
    # of (conservatively) counting them twice in the VMEM plan above.

    if ht is not None:
        n_ht = Hp // ht
        out_p = pl.pallas_call(
            _mlp_kernel_htiled,
            out_shape=out_shape,
            grid_spec=pltpu.PrefetchScalarGridSpec(
                num_scalar_prefetch=0,
                grid=(n_bt, n_ht),
                in_specs=[
                    pl.BlockSpec((tile_b, Dp), lambda i, h: (i, 0)),   # x tile
                    pl.BlockSpec((Dp, ht), lambda i, h: (0, h)),       # w1 slab
                    pl.BlockSpec((1, ht), lambda i, h: (0, h)),        # b1 slab
                    pl.BlockSpec((ht, Cp), lambda i, h: (h, 0)),       # w2 slab
                    pl.BlockSpec((1, Cp), lambda i, h: (0, 0)),        # b2
                ],
                out_specs=pl.BlockSpec((tile_b, Cp), lambda i, h: (i, 0)),
                scratch_shapes=[pltpu.VMEM((tile_b, Cp), jnp.float32)],
            ),
            compiler_params=pltpu.CompilerParams(
                dimension_semantics=("parallel", "arbitrary"),
                vmem_limit_bytes=vmem_limit),
            cost_estimate=cost,
        )(*args)
    elif n_bt > 1:
        out_p = pl.pallas_call(
            _mlp_kernel,
            out_shape=out_shape,
            grid_spec=pltpu.PrefetchScalarGridSpec(
                num_scalar_prefetch=0,
                grid=(n_bt,),
                in_specs=[
                    pl.BlockSpec((tile_b, Dp), lambda i: (i, 0)),      # x tile
                    pl.BlockSpec((Dp, Hp), lambda i: (0, 0)),          # w1 (resident)
                    pl.BlockSpec((1, Hp), lambda i: (0, 0)),           # b1
                    pl.BlockSpec((Hp, Cp), lambda i: (0, 0)),          # w2 (resident)
                    pl.BlockSpec((1, Cp), lambda i: (0, 0)),           # b2
                ],
                out_specs=pl.BlockSpec((tile_b, Cp), lambda i: (i, 0)),
            ),
            compiler_params=pltpu.CompilerParams(
                dimension_semantics=("parallel",),
                vmem_limit_bytes=vmem_limit),
            cost_estimate=cost,
        )(*args)
    else:
        # Small batch: one grid-less invocation, whole arrays resident in VMEM.
        out_p = pl.pallas_call(
            _mlp_kernel,
            out_shape=out_shape,
            in_specs=[pl.BlockSpec(memory_space=pltpu.MemorySpace.VMEM)] * 5,
            out_specs=pl.BlockSpec(memory_space=pltpu.MemorySpace.VMEM),
            compiler_params=pltpu.CompilerParams(vmem_limit_bytes=vmem_limit),
            cost_estimate=cost,
        )(*args)

    return out_p[:B, :out_features]


# ----------------------------------------------------------------------------
# JAX re-implementation of the Model wrapper semantics
# ----------------------------------------------------------------------------
class PallasModel:
    """Mirrors bootstrap Model: eval()/train(), prepare_batch, dict merging."""

    def __init__(self, network, criterions=None, metrics=None):
        self.network = network
        self.criterions = criterions or {}
        self.metrics = metrics or {}
        self.mode = "eval"          # Model.__init__ calls self.eval()
        self.training = False

    def eval(self):
        self.mode = "eval"
        self.training = False

    def train(self):
        self.mode = "train"
        self.training = True

    def prepare_batch(self, batch):
        # TODO(synk): cuda_tf / variable_tf (ToCuda / ToVariable) are framework
        # plumbing with no Pallas/JAX equivalent (device placement & autograd
        # wrapping are implicit); treated as identity + dtype normalization.
        out = {}
        for k, v in batch.items():
            arr = jnp.asarray(v)
            if jnp.issubdtype(arr.dtype, jnp.floating):
                arr = arr.astype(jnp.float32)
            out[k] = arr
        return out

    def forward(self, batch):
        batch = self.prepare_batch(batch)
        net_out = self.network(batch)

        cri_out = {}
        if self.mode in self.criterions:
            cri_tmp = self.criterions[self.mode](net_out, batch)
            if cri_tmp is not None:
                cri_out = cri_tmp

        met_out = {}
        if self.mode in self.metrics:
            met_tmp = self.metrics[self.mode](cri_out, net_out, batch)
            if met_tmp is not None:
                met_out = met_tmp

        out = {}
        if isinstance(net_out, dict):
            out.update(net_out)
        if isinstance(cri_out, dict):
            out.update(cri_out)
        if isinstance(met_out, dict):
            out.update(met_out)
        return out

    __call__ = forward


# ----------------------------------------------------------------------------
# Deterministic synthetic network using the Pallas kernel
# ----------------------------------------------------------------------------
def make_network(key, d_in, hidden, n_classes, compute_dtype=jnp.float32):
    k1, k2, k3, k4 = jax.random.split(key, 4)
    w1 = jax.random.normal(k1, (d_in, hidden), jnp.float32) * (1.0 / jnp.sqrt(d_in))
    b1 = jax.random.normal(k2, (1, hidden), jnp.float32) * 0.01
    w2 = jax.random.normal(k3, (hidden, n_classes), jnp.float32) * (1.0 / jnp.sqrt(hidden))
    b2 = jax.random.normal(k4, (1, n_classes), jnp.float32) * 0.01

    # Weight padding / casting hoisted out of the per-forward path (done once).
    w1_p, b1_p, w2_p, b2_p = prepare_mlp_params(w1, b1, w2, b2, compute_dtype)

    def network(batch):
        logits = mlp_forward(batch["data"], w1_p, b1_p, w2_p, b2_p,
                             out_features=n_classes)
        return {"logits": logits}

    return network, (w1, b1, w2, b2)


if __name__ == "__main__":
    key = jax.random.PRNGKey(0)
    k_net, k_net2, k_x, k_x2, k_x3, k_x4 = jax.random.split(key, 6)

    # --- small default network: exercises the no-grid, whole-VMEM path ------
    B, D_IN, HIDDEN, N_CLASSES = 16, 32, 64, 16
    network, (w1, b1, w2, b2) = make_network(k_net, D_IN, HIDDEN, N_CLASSES)
    model = PallasModel(network)          # criterions={}, metrics={}, mode='eval'

    x = jax.random.normal(k_x, (B, D_IN), jnp.float32)
    out = model({"data": x})
    logits = jax.block_until_ready(out["logits"])
    ref = jnp.maximum(x @ w1 + b1, 0.0) @ w2 + b2
    assert logits.shape == (B, N_CLASSES)
    assert jnp.allclose(logits, ref, atol=1e-4, rtol=1e-4), "f32 mismatch vs reference"

    # --- bf16 operands (all generations, incl. v5e), f32 MXU accumulation ---
    w1_pb, b1_pb, w2_pb, b2_pb = prepare_mlp_params(w1, b1, w2, b2, jnp.bfloat16)
    logits_bf16 = jax.block_until_ready(
        mlp_forward(x, w1_pb, b1_pb, w2_pb, b2_pb, out_features=N_CLASSES))
    xb, w1b, w2b = (t.astype(jnp.bfloat16) for t in (x, w1, w2))
    hb = jnp.maximum(jnp.dot(xb, w1b, preferred_element_type=jnp.float32) + b1, 0.0)
    ref_bf16 = jnp.dot(hb.astype(jnp.bfloat16), w2b,
                       preferred_element_type=jnp.float32) + b2
    assert jnp.allclose(logits_bf16, ref_bf16, atol=1e-2, rtol=1e-2), "bf16 mismatch"

    # --- large batch: batch-tiled ("parallel",) grid, two even 512-row tiles -
    w1_p, b1_p, w2_p, b2_p = prepare_mlp_params(w1, b1, w2, b2)
    B2 = 1024
    x2 = jax.random.normal(k_x2, (B2, D_IN), jnp.float32)
    logits2 = jax.block_until_ready(
        mlp_forward(x2, w1_p, b1_p, w2_p, b2_p, out_features=N_CLASSES))
    ref2 = jnp.maximum(x2 @ w1 + b1, 0.0) @ w2 + b2
    assert logits2.shape == (B2, N_CLASSES)
    assert jnp.allclose(logits2, ref2, atol=1e-3, rtol=1e-3), "tiled-grid mismatch"

    # --- ragged batch: tile_b sized to the batch (no round-up to 512 mult) ---
    B3 = 600   # -> 2 tiles of 304 rows (Bp=608), not Bp=1024
    x3 = jax.random.normal(k_x3, (B3, D_IN), jnp.float32)
    logits3 = jax.block_until_ready(
        mlp_forward(x3, w1_p, b1_p, w2_p, b2_p, out_features=N_CLASSES))
    ref3 = jnp.maximum(x3 @ w1 + b1, 0.0) @ w2 + b2
    assert logits3.shape == (B3, N_CLASSES)
    assert jnp.allclose(logits3, ref3, atol=1e-3, rtol=1e-3), "ragged-tile mismatch"

    # --- hidden-tiled accumulator path (VMEM-bound fallback), forced --------
    D2, H2, C2, B4 = 64, 384, 32, 24
    kw1, kw2 = jax.random.split(k_net2)
    w1_2 = jax.random.normal(kw1, (D2, H2), jnp.float32) * (1.0 / jnp.sqrt(D2))
    b1_2 = jnp.zeros((1, H2), jnp.float32)
    w2_2 = jax.random.normal(kw2, (H2, C2), jnp.float32) * (1.0 / jnp.sqrt(H2))
    b2_2 = jnp.full((1, C2), 0.01, jnp.float32)
    w1_2p, b1_2p, w2_2p, b2_2p = prepare_mlp_params(w1_2, b1_2, w2_2, b2_2)
    x4 = jax.random.normal(k_x4, (B4, D2), jnp.float32)
    logits4 = jax.block_until_ready(
        mlp_forward(x4, w1_2p, b1_2p, w2_2p, b2_2p,
                    out_features=C2, h_tile=128))
    ref4 = jnp.maximum(x4 @ w1_2 + b1_2, 0.0) @ w2_2 + b2_2
    assert logits4.shape == (B4, C2)
    assert jnp.allclose(logits4, ref4, atol=2e-3, rtol=2e-3), "h-tiled mismatch"

    print("KERNEL_OK")
</pallas_src>

<mosaic_0001>
module attributes {stable_mosaic.version = 11 : i64} {
  func.func @_mlp_kernel(%arg0: memref<16x128xf32, #tpu.memory_space<vmem>>, %arg1: memref<128x128xf32, #tpu.memory_space<vmem>>, %arg2: memref<1x128xf32, #tpu.memory_space<vmem>>, %arg3: memref<128x128xf32, #tpu.memory_space<vmem>>, %arg4: memref<1x128xf32, #tpu.memory_space<vmem>>, %arg5: memref<16x128xf32, #tpu.memory_space<vmem>>) attributes {dimension_semantics = [], scalar_prefetch = 0 : i64, scratch_operands = 0 : i64, tpu.core_type = #tpu.core_type<tc>} {
    %c0 = arith.constant 0 : index
    %c0_0 = arith.constant 0 : index
    %0 = vector.load %arg0[%c0, %c0_0] : memref<16x128xf32, #tpu.memory_space<vmem>>, vector<16x128xf32>
    %c0_1 = arith.constant 0 : index
    %c0_2 = arith.constant 0 : index
    %1 = vector.load %arg1[%c0_1, %c0_2] : memref<128x128xf32, #tpu.memory_space<vmem>>, vector<128x128xf32>
    %cst = arith.constant dense<0.000000e+00> : vector<16x128xf32>
    %2 = tpu.matmul %0, %1, %cst {dimension_numbers = #tpu.dot_dimension_numbers<[1], [0], [0], [1], [0, 0, 1, 1], [], []>} : vector<16x128xf32>, vector<128x128xf32>, vector<16x128xf32> -> vector<16x128xf32>
    %c0_3 = arith.constant 0 : index
    %c0_4 = arith.constant 0 : index
    %3 = vector.load %arg2[%c0_3, %c0_4] : memref<1x128xf32, #tpu.memory_space<vmem>>, vector<1x128xf32>
    %4 = vector.broadcast %3 : vector<1x128xf32> to vector<16x128xf32>
    %5 = arith.addf %2, %4 : vector<16x128xf32>
    %cst_5 = arith.constant 0.000000e+00 : f32
    %6 = vector.broadcast %cst_5 : f32 to vector<16x128xf32>
    %7 = arith.maximumf %5, %6 : vector<16x128xf32>
    %c0_6 = arith.constant 0 : index
    %c0_7 = arith.constant 0 : index
    %8 = vector.load %arg3[%c0_6, %c0_7] : memref<128x128xf32, #tpu.memory_space<vmem>>, vector<128x128xf32>
    %cst_8 = arith.constant dense<0.000000e+00> : vector<16x128xf32>
    %9 = tpu.matmul %7, %8, %cst_8 {dimension_numbers = #tpu.dot_dimension_numbers<[1], [0], [0], [1], [0, 0, 1, 1], [], []>} : vector<16x128xf32>, vector<128x128xf32>, vector<16x128xf32> -> vector<16x128xf32>
    %c0_9 = arith.constant 0 : index
    %c0_10 = arith.constant 0 : index
    %10 = vector.load %arg4[%c0_9, %c0_10] : memref<1x128xf32, #tpu.memory_space<vmem>>, vector<1x128xf32>
    %11 = vector.broadcast %10 : vector<1x128xf32> to vector<16x128xf32>
    %12 = arith.addf %9, %11 : vector<16x128xf32>
    %c0_11 = arith.constant 0 : index
    %c0_12 = arith.constant 0 : index
    %13 = vector.load %arg5[%c0_11, %c0_12] : memref<16x128xf32, #tpu.memory_space<vmem>>, vector<16x128xf32>
    tpu.vector_store %arg5[%c0_11, %c0_12], %12 {strides = array<i32>} : memref<16x128xf32, #tpu.memory_space<vmem>>, vector<16x128xf32>,
    return
  }
}

</mosaic_0001>

<bundles_post_ra>
// kernel: mlp_forward.1
= control target key start
LH: loop header
LB: loop body
LE: loop exit
PB: predicated region body
PF: predicated region fallthrough
CT: control target
= control target key end

     0   :  { %10 = vsyncpa [#allocation3], 0  ;;  %s347_s0 = inlined_call_operand.vmem [shape: f32[16,128], index: 0, kind: input, shape index: {}]   ;;  %s348_s1 = inlined_call_operand.hbm [shape: f32[128,128], index: 1, kind: input, shape index: {}]   ;;  %s349_s2 = inlined_call_operand.vmem [shape: f32[1,128], index: 2, kind: input, shape index: {}]   ;;  %s350_s3 = inlined_call_operand.hbm [shape: f32[128,128], index: 3, kind: input, shape index: {}]   ;;  %s351_s4 = inlined_call_operand.vmem [shape: f32[1,128], index: 4, kind: input, shape index: {}]   ;;  %s352_s5 = inlined_call_operand.hbm [shape: f32[16,128], index: 5, kind: output, shape index: {}]  }
   0x1   :  { %11 = vsyncpa [#allocation6], 0 }
   0x2   :  { %12 = vsyncpa [#allocation4], 0  ;;  %s19_s20 = sshll.u32 %s348_s1, 4  ;;  %s282_s21 = smov [#allocation2]   ;;  %s20_s20 = int_to_ptr.hbm [resolvable:$true] %s19_s20 }
   0x3   :  { %s21_s22 = sshll.u32 %s282_s21, 4  ;;  %s34_s25 = sshll.u32 %s350_s3, 4  ;;  %s22_s22 = int_to_ptr.vmem [resolvable:$true] %s21_s22  ;;  %s35_s25 = int_to_ptr.hbm [resolvable:$true] %s34_s25 }
   0x4   :  { %s283_s26 = smov 128   ;;  %s284_s27 = smov 8  }
   0x5   :  { %27 = dma.hbm_to_vmem [thread:$0]  %s20_s20, 2048, %s22_s22, [#allocation3], %s283_s26, %s283_s26, %s284_s27  }
   0x6   :  { %s285_s28 = smov [#allocation5]  }
   0x7   :  { %s36_s29 = sshll.u32 %s285_s28, 4  ;;  %s37_s29 = int_to_ptr.vmem [resolvable:$true] %s36_s29 }
   0x8   :  { %42 = dma.hbm_to_vmem [thread:$0]  %s35_s25, 2048, %s37_s29, [#allocation6], %s283_s26, %s283_s26, %s284_s27  }
   0x9   :  { %276 = dma.done.wait [#allocation3], 2048  }
   0xa   :  { %277 = vsyncadd [#allocation3], 4294965248 }
   0xb   :  { %278 = dma.done.wait [#allocation6], 2048  }
   0xc   :  { %279 = vsyncadd [#allocation6], 4294965248  ;;  %v70_v0 = vld [vmem:[#allocation2 + $0x78] sm:$0xff]  ;;  %v69_v1 = vld [vmem:[#allocation2 + $0x70] sm:$0xff]  ;;  %s286_s10 = smov [#allocation7]  }
   0xd   :  { %165 = vmatpush.msra.mxu2 %v70_v0  ;;  %75 = vmatpush.msra.mxu0 %v70_v0  ;;  %v68_v2 = vld [vmem:[#allocation2 + $0x68] sm:$0xff]  ;;  %v67_v3 = vld [vmem:[#allocation2 + $0x60] sm:$0xff]  ;;  %v66_v4 = vld [vmem:[#allocation2 + $0x58] sm:$0xff]  ;;  %s149_s11 = sshll.u32 %s286_s10, 4  ;;  %s150_s11 = int_to_ptr.vmem [resolvable:$true] %s149_s11 }
   0xe   :  { %v115_v5 = vld [vmem:[#allocation5 + $0x78] sm:$0xff]  ;;  %v114_v6 = vld [vmem:[#allocation5 + $0x70] sm:$0xff]  ;;  %v113_v8 = vld [vmem:[#allocation5 + $0x68] sm:$0xff] }
   0xf   :  { %166 = vmatpush.msra.mxu2 %v69_v1  ;;  %76 = vmatpush.msra.mxu0 %v69_v1  ;;  %v65_v7 = vld [vmem:[#allocation2 + $0x50] sm:$0xff]  ;;  %v64_v9 = vld [vmem:[#allocation2 + $0x48] sm:$0xff]  ;;  %v112_v10 = vld [vmem:[#allocation5 + $0x60] sm:$0xff] }
  0x10   :  { %181 = vmatpush.msra.mxu3 %v115_v5  ;;  %120 = vmatpush.msra.mxu1 %v115_v5  ;;  %v63_v11 = vld [vmem:[#allocation2 + $0x40] sm:$0xff]  ;;  %v111_v12 = vld [vmem:[#allocation5 + $0x58] sm:$0xff]  ;;  %v110_v14 = vld [vmem:[#allocation5 + $0x50] sm:$0xff] }
  0x11   :  { %167 = vmatpush.msra.mxu2 %v68_v2  ;;  %77 = vmatpush.msra.mxu0 %v68_v2  ;;  %v62_v13 = vld [vmem:[#allocation2 + $0x38] sm:$0xff]  ;;  %v61_v15 = vld [vmem:[#allocation2 + $0x30] sm:$0xff]  ;;  %v109_v16 = vld [vmem:[#allocation5 + $0x48] sm:$0xff] }
  0x12   :  { %182 = vmatpush.msra.mxu3 %v114_v6  ;;  %121 = vmatpush.msra.mxu1 %v114_v6  ;;  %v60_v17 = vld [vmem:[#allocation2 + $0x28] sm:$0xff]  ;;  %v108_v18 = vld [vmem:[#allocation5 + $0x40] sm:$0xff]  ;;  %v107_v20 = vld [vmem:[#allocation5 + $0x38] sm:$0xff] }
  0x13   :  { %168 = vmatpush.msra.mxu2 %v67_v3  ;;  %78 = vmatpush.msra.mxu0 %v67_v3  ;;  %v59_v19 = vld [vmem:[#allocation2 + $0x20] sm:$0xff]  ;;  %v58_v21 = vld [vmem:[#allocation2 + $0x18] sm:$0xff]  ;;  %v106_v22 = vld [vmem:[#allocation5 + $0x30] sm:$0xff] }
  0x14   :  { %183 = vmatpush.msra.mxu3 %v113_v8  ;;  %122 = vmatpush.msra.mxu1 %v113_v8  ;;  %v57_v23 = vld [vmem:[#allocation2 + $0x10] sm:$0xff]  ;;  %v105_v24 = vld [vmem:[#allocation5 + $0x28] sm:$0xff]  ;;  %v104_v26 = vld [vmem:[#allocation5 + $0x20] sm:$0xff] }
  0x15   :  { %169 = vmatpush.msra.mxu2 %v66_v4  ;;  %79 = vmatpush.msra.mxu0 %v66_v4  ;;  %v56_v25 = vld [vmem:[#allocation2 + $0x8] sm:$0xff]  ;;  %v55_v27 = vld [vmem:[#allocation2] sm:$0xff]  ;;  %v103_v30 = vld [vmem:[#allocation5 + $0x18] sm:$0xff] }
  0x16   :  { %184 = vmatpush.msra.mxu3 %v112_v10  ;;  %123 = vmatpush.msra.mxu1 %v112_v10  ;;  %v54_v28 = vld [vmem:[%s347_s0 + $0x8] sm:$0xff]  ;;  %v53_v29 = vld [vmem:[%s347_s0] sm:$0xff]  ;;  %v102_v31 = vld [vmem:[#allocation5 + $0x10] sm:$0xff] }
  0x17   :  { %170 = vmatpush.msra.mxu2 %v65_v7  ;;  %80 = vmatpush.msra.mxu0 %v65_v7  ;;  %v101_v32 = vld [vmem:[#allocation5 + $0x8] sm:$0xff]  ;;  %v100_v33 = vld [vmem:[#allocation5] sm:$0xff] }
  0x18   :  { %185 = vmatpush.msra.mxu3 %v111_v12  ;;  %124 = vmatpush.msra.mxu1 %v111_v12  ;;  %v202_v34 = vld [vmem:[%s349_s2] ss:$0 sm:$0xff]  ;;  %s151_s2 = sshll.u32 %s352_s5, 4  ;;  %s152_s2 = int_to_ptr.hbm [resolvable:$true] %s151_s2 }
  0x19   :  { %171 = vmatpush.msra.mxu2 %v64_v9  ;;  %81 = vmatpush.msra.mxu0 %v64_v9  ;;  %v203_v41 = vld [vmem:[%s351_s4] ss:$0 sm:$0xff] }
  0x1a   :  { %186 = vmatpush.msra.mxu3 %v110_v14  ;;  %125 = vmatpush.msra.mxu1 %v110_v14 }
  0x1b   :  { %172 = vmatpush.msra.mxu2 %v63_v11  ;;  %82 = vmatpush.msra.mxu0 %v63_v11 }
  0x1c   :  { %187 = vmatpush.msra.mxu3 %v109_v16  ;;  %126 = vmatpush.msra.mxu1 %v109_v16 }
  0x1d   :  { %173 = vmatpush.msra.mxu2 %v62_v13  ;;  %83 = vmatpush.msra.mxu0 %v62_v13 }
  0x1e   :  { %188 = vmatpush.msra.mxu3 %v108_v18  ;;  %127 = vmatpush.msra.mxu1 %v108_v18 }
  0x1f   :  { %174 = vmatpush.msra.mxu2 %v61_v15  ;;  %84 = vmatpush.msra.mxu0 %v61_v15 }
  0x20   :  { %189 = vmatpush.msra.mxu3 %v107_v20  ;;  %128 = vmatpush.msra.mxu1 %v107_v20 }
  0x21   :  { %175 = vmatpush.msra.mxu2 %v60_v17  ;;  %85 = vmatpush.msra.mxu0 %v60_v17 }
  0x22   :  { %190 = vmatpush.msra.mxu3 %v106_v22  ;;  %129 = vmatpush.msra.mxu1 %v106_v22 }
  0x23   :  { %176 = vmatpush.msra.mxu2 %v59_v19  ;;  %86 = vmatpush.msra.mxu0 %v59_v19 }
  0x24   :  { %191 = vmatpush.msra.mxu3 %v105_v24  ;;  %130 = vmatpush.msra.mxu1 %v105_v24 }
  0x25   :  { %177 = vmatpush.msra.mxu2 %v58_v21  ;;  %87 = vmatpush.msra.mxu0 %v58_v21 }
  0x26   :  { %192 = vmatpush.msra.mxu3 %v104_v26  ;;  %131 = vmatpush.msra.mxu1 %v104_v26 }
  0x27   :  { %178 = vmatpush.msra.mxu2 %v57_v23  ;;  %88 = vmatpush.msra.mxu0 %v57_v23 }
  0x28   :  { %193 = vmatpush.msra.mxu3 %v103_v30  ;;  %132 = vmatpush.msra.mxu1 %v103_v30 }
  0x29   :  { %179 = vmatpush.msra.mxu2 %v56_v25  ;;  %89 = vmatpush.msra.mxu0 %v56_v25 }
  0x2a   :  { %194 = vmatpush.msra.mxu3 %v102_v31  ;;  %133 = vmatpush.msra.mxu1 %v102_v31 }
  0x2b   :  { %180 = vmatpush.msra.mxu2 %v55_v27  ;;  %90 = vmatpush.msra.mxu0 %v55_v27 }
  0x2c   :  { %94 = vmatmul.f32.vlgmr.msra.gmra.mxu2 %v54_v28  ;;  %91 = vmatmul.f32.vlgmr.msra.gmra.mxu0 %v53_v29 }
  0x2d   :  { %195 = vmatpush.msra.mxu3 %v101_v32  ;;  %134 = vmatpush.msra.mxu1 %v101_v32 }
  0x2f   :  { %196 = vmatpush.msra.mxu3 %v100_v33  ;;  %135 = vmatpush.msra.mxu1 %v100_v33 }
  0xa9   :  { %v92_v35 = vpop.f32.mrf.mxu0 }
  0xaa   :  { %v93_v36 = vadd.f32 %v202_v34, %v92_v35 }
  0xac   :  { %v98_v37 = vmax.f32 %v93_v36, 0.0 }
  0xae   :  { %136 = vmatmul.f32.vlgmr.msra.gmra.mxu1 %v98_v37 }
  0xaf   :  { %v95_v38 = vpop.f32.mrf.mxu2 }
  0xb0   :  { %v96_v39 = vadd.f32 %v202_v34, %v95_v38 }
  0xb2   :  { %v99_v40 = vmax.f32 %v96_v39, 0.0 }
  0xb4   :  { %139 = vmatmul.f32.vlgmr.msra.gmra.mxu3 %v99_v40 }
 0x12b   :  { %v137_v42 = vpop.f32.mrf.mxu1 }
 0x12c   :  { %v138_v43 = vadd.f32 %v203_v41, %v137_v42 }
 0x12e   :  { %143 = vst [vmem:[#allocation7] sm:$0xff] %v138_v43 }
 0x137   :  { %v140_v44 = vpop.f32.mrf.mxu3 }
 0x138   :  { %v141_v45 = vadd.f32 %v203_v41, %v140_v44 }
 0x13a   :  { %144 = vst [vmem:[#allocation7 + $0x8] sm:$0xff] %v141_v45 }
 0x13b   :  { %157 = dma.vmem_to_hbm [thread:$0]  %s150_s11, 256, %s152_s2, [#allocation4], %s283_s26, %s283_s26, %s284_s27  }
 0x13c   :  { %280 = dma.done.wait [#allocation4], 256  }
 0x13d   :  { %281 = vsyncadd [#allocation4], 4294967040 }
 0x13e   :  { %162 = vsyncpa [#allocation3], 1 }
 0x13f   :  { %163 = vsyncpa [#allocation6], 1 }
 0x140   :  { %164 = vsyncpa [#allocation4], 1 }

</bundles_post_ra>
